<compile_context>
chip_gen: v5e
topology: v5e:2x2
jax: 0.10.0
libtpu: 0.0.40
codegen_flags: <defaults>
</compile_context>

<pallas_src>
import jax
import jax.numpy as jnp
from jax.experimental import pallas as pl
from jax.experimental.pallas import tpu as pltpu

B, C, H, W, D = 2, 1, 16, 16, 16
P = 4                                    # cubic patch size
T = (H // P) * (W // P) * (D // P)       # 64 tokens (4*4*4)
E = 32                                   # encoder embedding dim
PATCH_DIM = C * P * P * P                # 64
DEC_OUT = C * P * P * P                  # 64 (decoder predicts raw patch voxels)

ROWS = B * T                             # 128 tokens total
ROW_TILE = 64                            # rows per grid step (grid=(2,))
HALF_TILE = ROW_TILE // 2                # slab rows per grid step
SLAB_W = 2 * DEC_OUT                     # 128 -> lane-dense output
LN_EPS = 1e-6


def simmim_fused_kernel(patches_ref, mask_ref, w_emb_ref, w_dec_ref, pb_ref,
                        out_ref):
    # ---- packed small parameters (one DMA), sliced statically -------------
    pb = pb_ref[...]                       # (8, 128) f32
    b_emb = pb[0:1, :E]                    # (1, E)
    mtok = pb[1:2, :E]                     # (1, E)  SimMIM mask token
    ln_g = pb[2:3, :E]                     # (1, E)
    ln_b = pb[3:4, :E]                     # (1, E)
    b_dec = pb[4:5, :]                     # (1, 128) decoder bias, slab order

    # ---- encoder: patch embedding (Conv3d stride=P == matmul) -------------
    # bf16 operands on the MXU, f32 accumulation.
    z = jnp.dot(patches_ref[...], w_emb_ref[...],
                preferred_element_type=jnp.float32) + b_emb        # (ROW_TILE, E)

    # ---- SimMIM mask-token substitution (f32) -----------------------------
    z = jnp.where(mask_ref[...] > 0.5, mtok, z)

    # ---- LayerNorm over E, single-pass statistics, f32 --------------------
    inv_e = 1.0 / E
    s1 = jnp.sum(z, axis=-1, keepdims=True)
    s2 = jnp.sum(z * z, axis=-1, keepdims=True)
    mu = s1 * inv_e
    var = s2 * inv_e - mu * mu
    z = (z - mu) * jax.lax.rsqrt(var + LN_EPS)
    z = z * ln_g + ln_b

    # ---- decoder (1x1x1 conv == per-voxel matmul E -> C*P^3) --------------
    # reshape_embedding's permute and the decoder-side flatten cancel, so the
    # decoder consumes z rows directly.  The two row-halves of this tile are
    # matmul'd against block-diagonal weights so the result lands as a
    # lane-dense (HALF_TILE, 128) slab: lanes [:DEC_OUT] = first half rows,
    # lanes [DEC_OUT:] = second half rows.
    zb = z.astype(jnp.bfloat16)
    y = (jnp.dot(zb[:HALF_TILE, :], w_dec_ref[:E, :],
                 preferred_element_type=jnp.float32)
         + jnp.dot(zb[HALF_TILE:, :], w_dec_ref[E:, :],
                   preferred_element_type=jnp.float32))            # (HALF_TILE, 128)
    out_ref[...] = y + b_dec


def run_fused(patches, mask_rows, w_emb, w_dec_blk, pblock):
    nt = ROWS // ROW_TILE
    return pl.pallas_call(
        simmim_fused_kernel,
        out_shape=jax.ShapeDtypeStruct((ROWS // 2, SLAB_W), jnp.float32),
        grid=(nt,),
        in_specs=[
            pl.BlockSpec((ROW_TILE, PATCH_DIM), lambda i: (i, 0)),   # patches
            pl.BlockSpec((ROW_TILE, 1), lambda i: (i, 0)),           # mask
            pl.BlockSpec((PATCH_DIM, E), lambda i: (0, 0)),          # w_emb (pinned)
            pl.BlockSpec((2 * E, SLAB_W), lambda i: (0, 0)),         # w_dec block (pinned)
            pl.BlockSpec((8, 128), lambda i: (0, 0)),                # packed params (pinned)
        ],
        out_specs=pl.BlockSpec((HALF_TILE, SLAB_W), lambda i: (i, 0)),
        compiler_params=pltpu.CompilerParams(
            dimension_semantics=("parallel",)),   # shards row tiles across TCs on v7x
    )(patches, mask_rows, w_emb, w_dec_blk, pblock)


# ---------------------------- JAX glue (layout only) -------------------------

def patchify(x):
    # (B, C, H, W, D) -> (B, T, C*P^3), token order = (H//P, W//P, D//P)
    x = x.reshape(B, C, H // P, P, W // P, P, D // P, P)
    x = x.transpose(0, 2, 4, 6, 1, 3, 5, 7)
    return x.reshape(B, T, PATCH_DIM)


def unpatchify(y):
    # (B, T, C*P^3) -> (B, C, H, W, D)  (inverse of patchify)
    y = y.reshape(B, H // P, W // P, D // P, C, P, P, P)
    y = y.transpose(0, 4, 1, 5, 2, 6, 3, 7)
    return y.reshape(B, C, H, W, D)


def unpack_slab(slab):
    # (ROWS//2, 2*DEC_OUT) lane-dense slab -> (ROWS, DEC_OUT) token-major rows.
    nt = ROWS // ROW_TILE
    y = slab.reshape(nt, HALF_TILE, 2, DEC_OUT)
    y = y.transpose(0, 2, 1, 3)
    return y.reshape(ROWS, DEC_OUT)


def simmim3d_forward(x, mask, params):
    # encoder(x, mask) + reshape_embedding + decoder(z), all fused in one
    # pallas_call (the permute(0,2,1) of reshape_embedding and the decoder's
    # spatial flatten cancel exactly, so no intermediate HBM round-trip).
    patches = patchify(x).reshape(ROWS, PATCH_DIM).astype(jnp.bfloat16)
    mask_rows = mask.reshape(ROWS, 1).astype(jnp.float32)
    slab = run_fused(patches, mask_rows,
                     params["w_emb"], params["w_dec_blk"], params["pblock"])
    y = unpack_slab(slab)                                  # (B*T, C*P^3)
    return unpatchify(y.reshape(B, T, DEC_OUT))


def make_params(key):
    # TODO(synk): encoder/decoder are injected modules in the original code; a
    # representative SimMIM patch-embed encoder and 1x1x1-conv decoder are
    # instantiated here with deterministic synthetic weights.
    k1, k2, k3 = jax.random.split(key, 3)
    w_emb = 0.02 * jax.random.normal(k1, (PATCH_DIM, E), dtype=jnp.float32)
    mask_token = 0.02 * jax.random.normal(k2, (E,), dtype=jnp.float32)
    w_dec = 0.02 * jax.random.normal(k3, (E, DEC_OUT), dtype=jnp.float32)
    b_emb = jnp.zeros((E,), jnp.float32)
    ln_g = jnp.ones((E,), jnp.float32)
    ln_b = jnp.zeros((E,), jnp.float32)
    b_dec = jnp.zeros((DEC_OUT,), jnp.float32)

    # Packed small-parameter block: one (8,128) f32 DMA instead of five.
    pblock = jnp.zeros((8, 128), jnp.float32)
    pblock = pblock.at[0, :E].set(b_emb)
    pblock = pblock.at[1, :E].set(mask_token)
    pblock = pblock.at[2, :E].set(ln_g)
    pblock = pblock.at[3, :E].set(ln_b)
    pblock = pblock.at[4, :SLAB_W].set(jnp.tile(b_dec, 2))

    # Block-diagonal decoder weights -> lane-dense (·,128) decoder output.
    w_dec_blk = jnp.zeros((2 * E, SLAB_W), jnp.float32)
    w_dec_blk = w_dec_blk.at[:E, :DEC_OUT].set(w_dec)
    w_dec_blk = w_dec_blk.at[E:, DEC_OUT:].set(w_dec)

    return dict(
        w_emb=w_emb.astype(jnp.bfloat16),
        w_dec_blk=w_dec_blk.astype(jnp.bfloat16),
        pblock=pblock,
    )


if __name__ == "__main__":
    key = jax.random.PRNGKey(0)
    kx, km, kp = jax.random.split(key, 3)

    x = jax.random.normal(kx, (B, C, H, W, D), dtype=jnp.float32)
    mask = (jax.random.uniform(km, (B, T)) < 0.6).astype(jnp.float32)
    params = make_params(kp)

    out = simmim3d_forward(x, mask, params)
    jax.block_until_ready(out)
    assert out.shape == (B, C, H, W, D), out.shape
    assert out.dtype == jnp.float32
    print("KERNEL_OK")
</pallas_src>

<mosaic_0001>
module attributes {stable_mosaic.version = 11 : i64} {
  func.func @simmim_fused_kernel(%arg0: i32, %arg1: memref<64x64xbf16, #tpu.memory_space<vmem>>, %arg2: memref<64x1xf32, #tpu.memory_space<vmem>>, %arg3: memref<64x32xbf16, #tpu.memory_space<vmem>>, %arg4: memref<64x128xbf16, #tpu.memory_space<vmem>>, %arg5: memref<8x128xf32, #tpu.memory_space<vmem>>, %arg6: memref<32x128xf32, #tpu.memory_space<vmem>>) attributes {dimension_semantics = [#tpu.dimension_semantics<parallel>], iteration_bounds = array<i64: 2>, scalar_prefetch = 0 : i64, scratch_operands = 0 : i64, tpu.core_type = #tpu.core_type<tc>, window_params = [{transform_indices = @transform_0, window_bounds = array<i64: 64, 64>}, {transform_indices = @transform_1, window_bounds = array<i64: 64, 1>}, {pipeline_mode = #tpu.pipeline_mode<synchronous>, transform_indices = @transform_2, window_bounds = array<i64: 64, 32>}, {pipeline_mode = #tpu.pipeline_mode<synchronous>, transform_indices = @transform_3, window_bounds = array<i64: 64, 128>}, {pipeline_mode = #tpu.pipeline_mode<synchronous>, transform_indices = @transform_4, window_bounds = array<i64: 8, 128>}, {transform_indices = @transform_5, window_bounds = array<i64: 32, 128>}]} {
    %c0 = arith.constant 0 : index
    %c0_0 = arith.constant 0 : index
    %0 = vector.load %arg5[%c0, %c0_0] : memref<8x128xf32, #tpu.memory_space<vmem>>, vector<8x128xf32>
    %1 = vector.extract_strided_slice %0 {offsets = [0, 0], sizes = [1, 32], strides = [1, 1]} : vector<8x128xf32> to vector<1x32xf32>
    %2 = vector.extract_strided_slice %0 {offsets = [1, 0], sizes = [1, 32], strides = [1, 1]} : vector<8x128xf32> to vector<1x32xf32>
    %3 = vector.extract_strided_slice %0 {offsets = [2, 0], sizes = [1, 32], strides = [1, 1]} : vector<8x128xf32> to vector<1x32xf32>
    %4 = vector.extract_strided_slice %0 {offsets = [3, 0], sizes = [1, 32], strides = [1, 1]} : vector<8x128xf32> to vector<1x32xf32>
    %5 = vector.extract_strided_slice %0 {offsets = [4, 0], sizes = [1, 128], strides = [1, 1]} : vector<8x128xf32> to vector<1x128xf32>
    %c0_1 = arith.constant 0 : index
    %c0_2 = arith.constant 0 : index
    %6 = vector.load %arg1[%c0_1, %c0_2] : memref<64x64xbf16, #tpu.memory_space<vmem>>, vector<64x64xbf16>
    %c0_3 = arith.constant 0 : index
    %c0_4 = arith.constant 0 : index
    %7 = vector.load %arg3[%c0_3, %c0_4] : memref<64x32xbf16, #tpu.memory_space<vmem>>, vector<64x32xbf16>
    %cst = arith.constant dense<0.000000e+00> : vector<64x32xf32>
    %8 = tpu.matmul %6, %7, %cst {dimension_numbers = #tpu.dot_dimension_numbers<[1], [0], [0], [1], [0, 0, 1, 1], [], []>} : vector<64x64xbf16>, vector<64x32xbf16>, vector<64x32xf32> -> vector<64x32xf32>
    %9 = vector.broadcast %1 : vector<1x32xf32> to vector<64x32xf32>
    %10 = arith.addf %8, %9 : vector<64x32xf32>
    %c0_5 = arith.constant 0 : index
    %c0_6 = arith.constant 0 : index
    %11 = vector.load %arg2[%c0_5, %c0_6] : memref<64x1xf32, #tpu.memory_space<vmem>>, vector<64x1xf32>
    %cst_7 = arith.constant 5.000000e-01 : f32
    %12 = vector.broadcast %cst_7 : f32 to vector<64x1xf32>
    %13 = arith.cmpf ogt, %11, %12 : vector<64x1xf32>
    %14 = vector.shape_cast %13 : vector<64x1xi1> to vector<64x1xi1>
    %15 = vector.broadcast %14 : vector<64x1xi1> to vector<64x32xi1>
    %16 = vector.shape_cast %2 : vector<1x32xf32> to vector<1x32xf32>
    %17 = vector.broadcast %16 : vector<1x32xf32> to vector<64x32xf32>
    %18 = arith.select %15, %17, %10 : vector<64x32xi1>, vector<64x32xf32>
    %cst_8 = arith.constant dense<0.000000e+00> : vector<64xf32>
    %19 = vector.multi_reduction <add>, %18, %cst_8 [1] : vector<64x32xf32> to vector<64xf32>
    %20 = vector.shape_cast %19 : vector<64xf32> to vector<64x1xf32>
    %21 = arith.mulf %18, %18 : vector<64x32xf32>
    %cst_9 = arith.constant dense<0.000000e+00> : vector<64xf32>
    %22 = vector.multi_reduction <add>, %21, %cst_9 [1] : vector<64x32xf32> to vector<64xf32>
    %23 = vector.shape_cast %22 : vector<64xf32> to vector<64x1xf32>
    %cst_10 = arith.constant 3.125000e-02 : f32
    %24 = vector.broadcast %cst_10 : f32 to vector<64x1xf32>
    %25 = arith.mulf %20, %24 : vector<64x1xf32>
    %cst_11 = arith.constant 3.125000e-02 : f32
    %26 = vector.broadcast %cst_11 : f32 to vector<64x1xf32>
    %27 = arith.mulf %23, %26 : vector<64x1xf32>
    %28 = arith.mulf %25, %25 : vector<64x1xf32>
    %29 = arith.subf %27, %28 : vector<64x1xf32>
    %30 = vector.broadcast %25 : vector<64x1xf32> to vector<64x32xf32>
    %31 = arith.subf %18, %30 : vector<64x32xf32>
    %cst_12 = arith.constant 9.99999997E-7 : f32
    %32 = vector.broadcast %cst_12 : f32 to vector<64x1xf32>
    %33 = arith.addf %29, %32 : vector<64x1xf32>
    %34 = math.rsqrt %33 : vector<64x1xf32>
    %35 = vector.broadcast %34 : vector<64x1xf32> to vector<64x32xf32>
    %36 = arith.mulf %31, %35 : vector<64x32xf32>
    %37 = vector.broadcast %3 : vector<1x32xf32> to vector<64x32xf32>
    %38 = arith.mulf %36, %37 : vector<64x32xf32>
    %39 = vector.broadcast %4 : vector<1x32xf32> to vector<64x32xf32>
    %40 = arith.addf %38, %39 : vector<64x32xf32>
    %41 = arith.truncf %40 : vector<64x32xf32> to vector<64x32xbf16>
    %42 = vector.extract_strided_slice %41 {offsets = [0, 0], sizes = [32, 32], strides = [1, 1]} : vector<64x32xbf16> to vector<32x32xbf16>
    %c0_13 = arith.constant 0 : index
    %c0_14 = arith.constant 0 : index
    %43 = vector.load %arg4[%c0_13, %c0_14] : memref<64x128xbf16, #tpu.memory_space<vmem>>, vector<32x128xbf16>
    %cst_15 = arith.constant dense<0.000000e+00> : vector<32x128xf32>
    %44 = tpu.matmul %42, %43, %cst_15 {dimension_numbers = #tpu.dot_dimension_numbers<[1], [0], [0], [1], [0, 0, 1, 1], [], []>} : vector<32x32xbf16>, vector<32x128xbf16>, vector<32x128xf32> -> vector<32x128xf32>
    %45 = vector.extract_strided_slice %41 {offsets = [32, 0], sizes = [32, 32], strides = [1, 1]} : vector<64x32xbf16> to vector<32x32xbf16>
    %c32 = arith.constant 32 : index
    %c0_16 = arith.constant 0 : index
    %46 = vector.load %arg4[%c32, %c0_16] : memref<64x128xbf16, #tpu.memory_space<vmem>>, vector<32x128xbf16>
    %cst_17 = arith.constant dense<0.000000e+00> : vector<32x128xf32>
    %47 = tpu.matmul %45, %46, %cst_17 {dimension_numbers = #tpu.dot_dimension_numbers<[1], [0], [0], [1], [0, 0, 1, 1], [], []>} : vector<32x32xbf16>, vector<32x128xbf16>, vector<32x128xf32> -> vector<32x128xf32>
    %48 = arith.addf %44, %47 : vector<32x128xf32>
    %49 = vector.broadcast %5 : vector<1x128xf32> to vector<32x128xf32>
    %50 = arith.addf %48, %49 : vector<32x128xf32>
    %c0_18 = arith.constant 0 : index
    %c0_19 = arith.constant 0 : index
    %51 = vector.load %arg6[%c0_18, %c0_19] : memref<32x128xf32, #tpu.memory_space<vmem>>, vector<32x128xf32>
    tpu.vector_store %arg6[%c0_18, %c0_19], %50 {strides = array<i32>} : memref<32x128xf32, #tpu.memory_space<vmem>>, vector<32x128xf32>,
    return
  }
  func.func @transform_0(%arg0: i32) -> (i32, i32) {
    %c0_i32 = arith.constant 0 : i32
    %c0_i32_0 = arith.constant 0 : i32
    return %arg0, %c0_i32 : i32, i32
  }
  func.func @transform_1(%arg0: i32) -> (i32, i32) {
    %c0_i32 = arith.constant 0 : i32
    %c0_i32_0 = arith.constant 0 : i32
    return %arg0, %c0_i32 : i32, i32
  }
  func.func @transform_2(%arg0: i32) -> (i32, i32) {
    %c0_i32 = arith.constant 0 : i32
    %c0_i32_0 = arith.constant 0 : i32
    %c0_i32_1 = arith.constant 0 : i32
    return %c0_i32, %c0_i32_0 : i32, i32
  }
  func.func @transform_3(%arg0: i32) -> (i32, i32) {
    %c0_i32 = arith.constant 0 : i32
    %c0_i32_0 = arith.constant 0 : i32
    %c0_i32_1 = arith.constant 0 : i32
    return %c0_i32, %c0_i32_0 : i32, i32
  }
  func.func @transform_4(%arg0: i32) -> (i32, i32) {
    %c0_i32 = arith.constant 0 : i32
    %c0_i32_0 = arith.constant 0 : i32
    %c0_i32_1 = arith.constant 0 : i32
    return %c0_i32, %c0_i32_0 : i32, i32
  }
  func.func @transform_5(%arg0: i32) -> (i32, i32) {
    %c0_i32 = arith.constant 0 : i32
    %c0_i32_0 = arith.constant 0 : i32
    return %arg0, %c0_i32 : i32, i32
  }
}

</mosaic_0001>

<bundles_post_ra>
// kernel: tpu_custom_call.1
= control target key start
LH: loop header
LB: loop body
LE: loop exit
PB: predicated region body
PF: predicated region fallthrough
CT: control target
= control target key end

     0   :  { %10 = vsyncpa [#allocation3], 0  ;;  %s1432_s0 = inlined_call_operand.vmem [shape: bf16[128,64], index: 0, kind: input, shape index: {}]   ;;  %s1433_s1 = inlined_call_operand.vmem [shape: f32[128,1], index: 1, kind: input, shape index: {}]   ;;  %s1434_s2 = inlined_call_operand.vmem [shape: bf16[64,32], index: 2, kind: input, shape index: {}]   ;;  %s1435_s3 = inlined_call_operand.vmem [shape: bf16[64,128], index: 3, kind: input, shape index: {}]   ;;  %s1436_s4 = inlined_call_operand.vmem [shape: f32[8,128], index: 4, kind: input, shape index: {}]   ;;  %s1437_s5 = inlined_call_operand.hbm [shape: f32[64,128], index: 5, kind: output, shape index: {}]  }
   0x1   :  { %12 = vsyncpa [#allocation3 + $0x1], 0  ;;  %s1083_s18 = smov 0   ;;  %s1085_s19 = smov 0  }
   0x2   :  { %s1087_s20 = smov 0   ;;  %s1089_s21 = smov 0  }
   0x3 LB: > { %s1104_s22 = sadd.s32 4294967295, %s1048_s21   ;;  %s838_s23 = sadd.s32 4294967294, %s1048_s21   ;;  %s1048_s21 = sphi %s1089_s21, %s1449_s21   ;;  %s1044_s20 = sphi %s1087_s20, %s1448_s20   ;;  %s1040_s19 = sphi %s1085_s19, %s1447_s19   ;;  %s1036_s18 = sphi %s1083_s18, %s1446_s18  }
   0x4   : > { %s1108_s24 = sadd.s32 1, %s1048_s21   ;;  %s140_s25 = sadd.s32 1, %s1044_s20 }
   0x5   : > { %s137_s26 = ssub.s32 %s1048_s21, %s1108_s24  ;;  %p150_p0 = scmp.ne.s32.totalorder %s1044_s20, %s1040_s19 }
   0x6   : > { %p138_p1 = scmp.eq.s32.totalorder %s137_s26, 0  ;;  %p151_p2 = scmp.eq.s32.totalorder %s1104_s22, 1 }
   0x7   : > { %p156_p3 = scmp.ne.s32.totalorder %s1040_s19, %s1036_s18  ;;  %p157_p4 = scmp.eq.s32.totalorder %s838_s23, 1 }
   0x8   : > { %s1119_s27 = scalar_select %p138_p1, %s1044_s20, %s140_s25  }
   0x9   : > { %p1121_p5 = por %p151_p2, %p150_p0  ;;  %p1125_p6 = por %p157_p4, %p156_p3 }
   0xa   : > { %p841_p7 = scmp.ge.s32.totalorder %s1048_s21, 1  ;;  %p202_p8 = scmp.lt.s32.totalorder %s1048_s21, 3 }
   0xc   : > { %p203_p9 = pnand %p841_p7, %p202_p8 }
   0xd   : > { %s843_s7 = sshll.u32 (!%p203_p9), %s1104_s22, 3  ;;  %s920_s25 = sshll.u32 (!%p203_p9), %s1104_s22, 5 }
   0xe   : > { %206 = sbr.rel (%p203_p9) target bundleno = 502 (0x1f6), region = 40  ;;  %p236_p10 = scmp.lt.s32.totalorder (!%p203_p9), %s843_s7, 15 }
   0xf   : > { %s760_s6 = scalar_lea.hbm (!%p203_p9), %s1437_s5, %s920_s25  ;;  %s1006_s13 = scalar_lea.hbm (!%p203_p9), %s1437_s5, 64 }
  0x10   : > { %s763_s8 = sshll.u32 (!%p203_p9), %s760_s6, 4  ;;  %s764_s8 = int_to_ptr.hbm [resolvable:$true] %s763_s8 }
  0x13   : > { %v915_v0 = vld [vmem:[%s1434_s2 + $0x18] sm:$0xff]  ;;  %v1050_v1 = vmov 0   ;;  %v914_v2 = vld [vmem:[%s1434_s2 + $0x10] sm:$0xff]  ;;  %s1451_s7 = smov (!%p236_p10, %s843_s7), 15  ;;  %v913_v3 = vld [vmem:[%s1434_s2 + $0x8] sm:$0xff]  ;;  %vm311_vm5 = vcmask 523264  }
  0x14   : > { %967 = vset.pattern.permute.xlu0 %v1050_v1  ;;  %968 = vset.pattern.permute.xlu1 %v1050_v1  ;;  %s846_s10 = sshll.u32 %s1451_s7, 3  ;;  %s844_s16 = sshll.u32 %s1451_s7, 2  ;;  %v912_v7 = vld [vmem:[%s1434_s2] sm:$0xff]  ;;  %vm418_vm10 = vcmask 261120  }
  0x15   : > { %328 = vmatpush.bf16.msra.mxu0 %v915_v0  ;;  %921 = vmatpush.bf16.msra.mxu3 %v915_v0  ;;  %s1144_s15 = scalar_lea.vmem %s1433_s1, %s846_s10  ;;  %s1154_s30 = scalar_lea.vmem %s1432_s0, %s844_s16  ;;  %v1173_v25 = vld [vmem:[%s1436_s4] sm:$0xff] }
  0x16   : > { %969 = vset.pattern.permute.xlu2 %v1050_v1  ;;  %v353_v4 = vld [vmem:[%s1144_s15] sm:$0xff]  ;;  %v354_v9 = vld [vmem:[%s1144_s15 + $0x8] sm:$0xff]  ;;  %v355_v11 = vld [vmem:[%s1144_s15 + $0x10] sm:$0xff]  ;;  %v1176_v26 = vperm.slane %v1173_v25, 0  ;;  %v1179_v28 = vperm.slane %v1173_v25, 1  ;;  %s232_s16 = sand.u32 1, %s1040_s19  }
  0x17   : > { %vm361_vm0 = vcmp.gt.f32.partialorder %v353_v4, 0.5  ;;  %v357_v5 = vld [vmem:[%s1144_s15 + $0x20] sm:$0xff]  ;;  %v358_v10 = vld [vmem:[%s1144_s15 + $0x28] sm:$0xff]  ;;  %vm363_vm2 = vcmp.gt.f32.partialorder %v355_v11, 0.5  ;;  %v910_v13 = vld [vmem:[%s1154_s30 + $0x10] sm:$0xff]  ;;  %vm362_vm3 = vcmp.gt.f32.partialorder %v354_v9, 0.5 }
  0x18   : > { %v369_v6 = vsel %vm361_vm0, 1, %v1050_v1  ;;  %vm365_vm1 = vcmp.gt.f32.partialorder %v357_v5, 0.5  ;;  %v908_v12 = vld [vmem:[%s1154_s30] sm:$0xff]  ;;  %vm366_vm4 = vcmp.gt.f32.partialorder %v358_v10, 0.5  ;;  %v371_v14 = vsel %vm363_vm2, 1, %v1050_v1  ;;  %v356_v15 = vld [vmem:[%s1144_s15 + $0x18] sm:$0xff] }
  0x19   : > { %329 = vmatpush.bf16.msra.mxu0 %v914_v2  ;;  %922 = vmatpush.bf16.msra.mxu3 %v914_v2  ;;  %v373_v8 = vsel %vm365_vm1, 1, %v1050_v1  ;;  %v370_v16 = vsel %vm362_vm3, 1, %v1050_v1  ;;  %v374_v17 = vsel %vm366_vm4, 1, %v1050_v1  ;;  %vm364_vm6 = vcmp.gt.f32.partialorder %v356_v15, 0.5  ;;  %v359_v18 = vld [vmem:[%s1144_s15 + $0x30] sm:$0xff]  ;;  %v360_v19 = vld [vmem:[%s1144_s15 + $0x38] sm:$0xff] }
  0x1a   : > { %378 = vperm.xlu0 %967, %v369_v6   ;;  %390 = vperm.xlu1 %968, %v373_v8   ;;  %v372_v20 = vsel %vm364_vm6, 1, %v1050_v1  ;;  %vm367_vm7 = vcmp.gt.f32.partialorder %v359_v18, 0.5  ;;  %vm368_vm8 = vcmp.gt.f32.partialorder %v360_v19, 0.5  ;;  %v909_v23 = vld [vmem:[%s1154_s30 + $0x8] sm:$0xff]  ;;  %v911_v24 = vld [vmem:[%s1154_s30 + $0x18] sm:$0xff]  ;;  %s842_s17 = sshll.u32 %s232_s16, 5 }
  0x1b   : > { %384 = vperm.xlu2 %969, %v371_v14   ;;  %v375_v21 = vsel %vm367_vm7, 1, %v1050_v1  ;;  %v376_v22 = vsel %vm368_vm8, 1, %v1050_v1  ;;  %s234_s23 = scalar_lea.vmem [#allocation2], %s842_s17  ;;  %s749_s9 = scalar_lea.sflag [#allocation3], %s232_s16 }
  0x1c   : > { %s761_s7 = sshll.u32 %s234_s23, 4  ;;  %s1000_s10 = sshra.s32 %s764_s8, 4  ;;  %s762_s7 = int_to_ptr.vmem [resolvable:$true] %s761_s7  ;;  %s1001_s10 = int_to_ptr.hbm [resolvable:$true] %s1000_s10 }
  0x1d   : > { %330 = vmatpush.bf16.msra.mxu0 %v913_v3  ;;  %923 = vmatpush.bf16.msra.mxu3 %v913_v3  ;;  %s1002_s22 = scalar_lea.hbm %s1001_s10, 32  ;;  %p1007_p0 = scmp.lt.s32.totalorder %s1001_s10, %s1437_s5 }
  0x1e   : > { %p1003_p11 = scmp.ne.s32.totalorder %s1001_s10, %s1002_s22  ;;  %p1008_p1 = scmp.lt.s32.totalorder %s1006_s13, %s1002_s22 }
  0x20   : > { %p1004_p12 = pnand %p1003_p11, %p1121_p5  ;;  %p1009_p2 = por %p1008_p1, %p1007_p0 }
  0x21   : > { %331 = vmatpush.bf16.msra.mxu0 %v912_v7  ;;  %924 = vmatpush.bf16.msra.mxu3 %v912_v7 }
  0x22   : > { %381 = vperm.xlu0 %967, %v370_v16   ;;  %393 = vperm.xlu1 %968, %v374_v17   ;;  %p1005_p13 = pneg %p1004_p12 }
  0x23   : > { %387 = vperm.xlu2 %969, %v372_v20  }
  0x24   : > { %879 = vmatmul.msk.bf16.vlgmr.msra.gmra.mxu0 %vm311_vm5, %v908_v12  ;;  %881 = vmatmul.msk.bf16.vlgmr.msra.gmra.mxu3 %vm311_vm5, %v910_v13  ;;  %p1010_p3 = pnand %p1009_p2, %p1005_p13 }
  0x2a   : > { %396 = vperm.xlu0 %967, %v375_v21   ;;  %399 = vperm.xlu1 %968, %v376_v22  }
  0x34   : > { %880 = vmatmul.msk.bf16.gmra.mxu0 %vm311_vm5, %v909_v23  ;;  %882 = vmatmul.msk.bf16.gmra.mxu3 %vm311_vm5, %v911_v24 }
  0x75   : > { %v385_v47 = vpop.permute.xlu2 %384 }
  0x76   : > { %vm403_vm14 = vcmp.eq.s32.totalorder %v385_v47, 1  ;;  %v916_v47 = vld [vmem:[%s1435_s3] sm:$0xff] }
  0x7d   : > { %v388_v60 = vpop.permute.xlu2 %387 }
  0x7e   : > { %vm404_vm0 = vcmp.eq.s32.totalorder %v388_v60, 1 }
  0x8c   : > { %v379_v27 = vpop.permute.xlu0 %378  ;;  %v391_v34 = vpop.permute.xlu1 %390 }
  0x8d   : > { %vm401_vm9 = vcmp.eq.s32.totalorder %v379_v27, 1  ;;  %vm405_vm11 = vcmp.eq.s32.totalorder %v391_v34, 1 }
  0x94   : > { %v382_v39 = vpop.permute.xlu0 %381  ;;  %v394_v49 = vpop.permute.xlu1 %393 }
  0x95   : > { %vm402_vm12 = vcmp.eq.s32.totalorder %v382_v39, 1  ;;  %vm406_vm13 = vcmp.eq.s32.totalorder %v394_v49, 1 }
  0x9c   : > { %v397_v57 = vpop.permute.xlu0 %396  ;;  %v400_v7 = vpop.permute.xlu1 %399 }
  0x9d   : > { %vm407_vm15 = vcmp.eq.s32.totalorder %v397_v57, 1  ;;  %vm408_vm1 = vcmp.eq.s32.totalorder %v400_v7, 1 }
  0xa1   : > { %v333_v29 = vpop.f32.mrf.mxu0 }
  0xa2   : > { %v334_v30 = vadd.f32 %v333_v29, %v1176_v26 }
  0xa4   : > { %v1183_v31 = vsel %vm401_vm9, %v1179_v28, %v334_v30 }
  0xa5   : > { %v419_v32 = vsel %vm418_vm10, %v1183_v31, 0.0  ;;  %v443_v33 = vmul.f32 %v1183_v31, %v1183_v31 }
  0xa6   : > { %420 = vadd.xlane.f32.xlu2 %v419_v32 }
  0xa7   : > { %v343_v35 = vpop.f32.mrf.mxu3  ;;  %v451_v36 = vsel %vm418_vm10, %v443_v33, 0.0 }
  0xa8   : > { %v344_v37 = vadd.f32 %v343_v35, %v1176_v26  ;;  %452 = vadd.xlane.f32.xlu1 %v451_v36  ;;  %v917_v36 = vld [vmem:[%s1435_s3 + $0x8] sm:$0xff] }
  0xa9   : > { %v335_v38 = vpop.f32.mrf.mxu0  ;;  %726 = vmatpush.bf16.msra.mxu2 %v917_v36 }
  0xaa   : > { %v336_v40 = vadd.f32 %v335_v38, %v1176_v26  ;;  %v1193_v41 = vsel %vm405_vm11, %v1179_v28, %v344_v37 }
  0xab   : > { %v431_v42 = vsel %vm418_vm10, %v1193_v41, 0.0  ;;  %v447_v43 = vmul.f32 %v1193_v41, %v1193_v41 }
  0xac   : > { %v1200_v44 = vsel %vm402_vm12, %v1179_v28, %v336_v40 }
  0xad   : > { %v422_v45 = vsel %vm418_vm10, %v1200_v44, 0.0  ;;  %v463_v46 = vsel %vm418_vm10, %v447_v43, 0.0  ;;  %v444_v52 = vmul.f32 %v1200_v44, %v1200_v44  ;;  %727 = vmatpush.bf16.msra.mxu2 %v916_v47 }
  0xae   : > { %423 = vadd.xlane.f32.xlu0 %v422_v45  ;;  %432 = vadd.xlane.f32.xlu2 %v431_v42 }
  0xaf   : > { %v345_v48 = vpop.f32.mrf.mxu3  ;;  %v454_v56 = vsel %vm418_vm10, %v444_v52, 0.0  ;;  %v919_v52 = vld [vmem:[%s1435_s3 + $0x18] sm:$0xff] }
  0xb0   : > { %v346_v50 = vadd.f32 %v345_v48, %v1176_v26  ;;  %464 = vadd.xlane.f32.xlu1 %v463_v46  ;;  %679 = vmatpush.bf16.msra.mxu1 %v919_v52 }
  0xb1   : > { %v338_v51 = vpop.f32.mrf.mxu0 }
  0xb2   : > { %v1209_v53 = vsel %vm406_vm13, %v1179_v28, %v346_v50  ;;  %v339_v54 = vadd.f32 %v338_v51, %v1176_v26 }
  0xb3   : > { %v434_v55 = vsel %vm418_vm10, %v1209_v53, 0.0  ;;  %v448_v63 = vmul.f32 %v1209_v53, %v1209_v53 }
  0xb4   : > { %v1217_v61 = vsel %vm403_vm14, %v1179_v28, %v339_v54 }
  0xb5   : > { %v425_v3 = vsel %vm418_vm10, %v1217_v61, 0.0  ;;  %v466_v4 = vsel %vm418_vm10, %v448_v63, 0.0  ;;  %v445_v10 = vmul.f32 %v1217_v61, %v1217_v61 }
  0xb6   : > { %435 = vadd.xlane.f32.xlu0 %v434_v55  ;;  %455 = vadd.xlane.f32.xlu2 %v454_v56 }
  0xb7   : > { %v348_v58 = vpop.f32.mrf.mxu3  ;;  %v457_v14 = vsel %vm418_vm10, %v445_v10, 0.0 }
  0xb8   : > { %v349_v59 = vadd.f32 %v348_v58, %v1176_v26 }
  0xb9   : > { %v340_v62 = vpop.f32.mrf.mxu0 }
  0xba   : > { %v341_v0 = vadd.f32 %v340_v62, %v1176_v26  ;;  %v1223_v1 = vsel %vm407_vm15, %v1179_v28, %v349_v59  ;;  %v918_v62 = vld [vmem:[%s1435_s3 + $0x10] sm:$0xff] }
  0xbb   : > { %v437_v2 = vsel %vm418_vm10, %v1223_v1, 0.0  ;;  %v449_v16 = vmul.f32 %v1223_v1, %v1223_v1  ;;  %680 = vmatpush.bf16.msra.mxu1 %v918_v62 }
  0xbc   : > { %438 = vadd.xlane.f32.xlu1 %v437_v2  ;;  %v1231_v5 = vsel %vm404_vm0, %v1179_v28, %v341_v0 }
  0xbd   : > { %v446_v9 = vmul.f32 %v1231_v5, %v1231_v5  ;;  %v428_v11 = vsel %vm418_vm10, %v1231_v5, 0.0  ;;  %v469_v18 = vsel %vm418_vm10, %v449_v16, 0.0 }
  0xbe   : > { %426 = vadd.xlane.f32.xlu0 %v425_v3  ;;  %467 = vadd.xlane.f32.xlu2 %v466_v4 }
  0xbf   : > { %v350_v6 = vpop.f32.mrf.mxu3  ;;  %v460_v13 = vsel %vm418_vm10, %v446_v9, 0.0 }
  0xc0   : > { %v351_v8 = vadd.f32 %v350_v6, %v1176_v26 }
  0xc2   : > { %v1241_v12 = vsel %vm408_vm1, %v1179_v28, %v351_v8 }
  0xc3   : > { %v450_v15 = vmul.f32 %v1241_v12, %v1241_v12  ;;  %v440_v19 = vsel %vm418_vm10, %v1241_v12, 0.0 }
  0xc4   : > { %429 = vadd.xlane.f32.xlu1 %v428_v11 }
  0xc5   : > { %v472_v17 = vsel %vm418_vm10, %v450_v15, 0.0 }
  0xc6   : > { %461 = vadd.xlane.f32.xlu0 %v460_v13  ;;  %458 = vadd.xlane.f32.xlu2 %v457_v14 }
  0xcc   : > { %473 = vadd.xlane.f32.xlu1 %v472_v17 }
  0xce   : > { %470 = vadd.xlane.f32.xlu0 %v469_v18  ;;  %441 = vadd.xlane.f32.xlu2 %v440_v19 }
 0x119   : > { %v421_v20 = vpop.xlane.xlu2 %420 }
 0x11a   : > { %v1253_v21 = vmul.f32 0.03125, %v421_v20 }
 0x11b   : > { %v453_v22 = vpop.xlane.xlu1 %452 }
 0x11c   : > { %v491_v23 = vmul.f32 %v1253_v21, %v1253_v21  ;;  %v483_v24 = vmul.f32 0.03125, %v453_v22  ;;  %v507_v17 = vsub.f32 %v1183_v31, %v1253_v21 }
 0x11e   : > { %v499_v26 = vsub.f32 %v483_v24, %v491_v23  ;;  %v1307_v24 = vperm.slane %v1173_v25, 2 }
 0x120   : > { %v515_v27 = vadd.f32 1e-06, %v499_v26 }
 0x121   : > { %v424_v28 = vpop.xlane.xlu0 %423  ;;  %v433_v29 = vpop.xlane.xlu2 %432 }
 0x122   : > { %970 = vrsqrt.f32 %v515_v27  ;;  %v1257_v30 = vmul.f32 0.03125, %v433_v29  ;;  %v1261_v35 = vmul.f32 0.03125, %v424_v28  ;;  %vm529_vm3 = vweird.f32 %v515_v27 }
 0x123   : > { %v465_v32 = vpop.xlane.xlu1 %464 }
 0x124   : > { %v495_v33 = vmul.f32 %v1257_v30, %v1257_v30  ;;  %v487_v34 = vmul.f32 0.03125, %v465_v32  ;;  %v492_v45 = vmul.f32 %v1261_v35, %v1261_v35 }
 0x126   : > { %v503_v37 = vsub.f32 %v487_v34, %v495_v33 }
 0x128   : > { %v971_v38 = vpop.eup %970  ;;  %v1266_v40 = vadd.f32 1e-06, %v503_v37  ;;  %v1319_v37 = vperm.slane %v1173_v25, 3 }
 0x129   : > { %v524_v39 = vmul.f32 %v971_v38, %v515_v27  ;;  %v436_v42 = vpop.xlane.xlu0 %435  ;;  %v456_v43 = vpop.xlane.xlu2 %455  ;;  %vm530_vm2 = vweird.f32 %v971_v38 }
 0x12a   : > { %v484_v46 = vmul.f32 0.03125, %v456_v43  ;;  %972 = vrsqrt.f32 %v1266_v40  ;;  %v1277_v54 = vmul.f32 0.03125, %v436_v42  ;;  %vm1289_vm4 = vmor %vm529_vm3, %vm530_vm2  ;;  %vm569_vm7 = vweird.f32 %v1266_v40 }
 0x12b   : > { %v525_v48 = vmul.f32 %v971_v38, %v524_v39 }
 0x12c   : > { %v500_v49 = vsub.f32 %v484_v46, %v492_v45  ;;  %v496_v63 = vmul.f32 %v1277_v54, %v1277_v54  ;;  %v508_v46 = vsub.f32 %v1200_v44, %v1261_v35 }
 0x12d   : > { %v526_v50 = vmul.f32 0.5, %v525_v48 }
 0x12e   : > { %v516_v51 = vadd.f32 1e-06, %v500_v49  ;;  %v511_v49 = vsub.f32 %v1193_v41, %v1257_v30 }
 0x12f   : > { %v439_v55 = vpop.xlane.xlu1 %438  ;;  %v527_v56 = vsub.f32 1.5, %v526_v50 }
 0x130   : > { %974 = vrsqrt.f32 %v516_v51  ;;  %v1279_v57 = vpop.eup %972  ;;  %v1313_v33 = vmul.f32 0.03125, %v439_v55  ;;  %vm539_vm9 = vweird.f32 %v516_v51 }
 0x131   : > { %v427_v58 = vpop.xlane.xlu0 %426  ;;  %v468_v59 = vpop.xlane.xlu2 %467  ;;  %v564_v60 = vmul.f32 %v1279_v57, %v1266_v40  ;;  %v528_v2 = vmul.f32 %v971_v38, %v527_v56  ;;  %vm570_vm5 = vweird.f32 %v1279_v57 }
 0x132   : > { %v488_v0 = vmul.f32 0.03125, %v468_v59  ;;  %v1293_v10 = vmul.f32 0.03125, %v427_v58  ;;  %vm1321_vm8 = vmor %vm569_vm7, %vm570_vm5 }
 0x133   : > { %v565_v3 = vmul.f32 %v1279_v57, %v564_v60  ;;  %v532_v14 = vsel %vm1289_vm4, %v971_v38, %v528_v2 }
 0x134   : > { %v504_v4 = vsub.f32 %v488_v0, %v496_v63  ;;  %v493_v27 = vmul.f32 %v1293_v10, %v1293_v10  ;;  %v603_v29 = vmul.f32 %v532_v14, %v507_v17 }
 0x135   : > { %v566_v7 = vmul.f32 0.5, %v565_v3 }
 0x136   : > { %v975_v6 = vpop.eup %974  ;;  %v1295_v11 = vadd.f32 1e-06, %v504_v4  ;;  %v612_v45 = vmul.f32 %v1307_v24, %v603_v29 }
 0x137   : > { %v534_v9 = vmul.f32 %v975_v6, %v516_v51  ;;  %v430_v13 = vpop.xlane.xlu1 %429  ;;  %v567_v15 = vsub.f32 1.5, %v566_v7  ;;  %vm540_vm6 = vweird.f32 %v975_v6  ;;  %v497_v51 = vmul.f32 %v1313_v33, %v1313_v33 }
 0x138   : > { %v1299_v16 = vmul.f32 0.03125, %v430_v13  ;;  %976 = vrsqrt.f32 %v1295_v11  ;;  %vm541_vm11 = vmor %vm539_vm9, %vm540_vm6  ;;  %v621_v58 = vadd.f32 %v1319_v37, %v612_v45  ;;  %vm579_vm13 = vweird.f32 %v1295_v11 }
 0x139   : > { %v535_v18 = vmul.f32 %v975_v6, %v534_v9  ;;  %v462_v19 = vpop.xlane.xlu0 %461  ;;  %v459_v20 = vpop.xlane.xlu2 %458  ;;  %v568_v31 = vmul.f32 %v1279_v57, %v567_v15 }
 0x13a   : > { %v494_v22 = vmul.f32 %v1299_v16, %v1299_v16  ;;  %v486_v23 = vmul.f32 0.03125, %v462_v19  ;;  %v485_v28 = vmul.f32 0.03125, %v459_v20  ;;  %v629_v9 = vpack.c.bf16 %v621_v58, %v621_v58 }
 0x13b   : > { %v536_v26 = vmul.f32 0.5, %v535_v18  ;;  %v572_v40 = vsel %vm1321_vm8, %v1279_v57, %v568_v31 }
 0x13c   : > { %v502_v21 = vsub.f32 %v486_v23, %v494_v22  ;;  %v501_v34 = vsub.f32 %v485_v28, %v493_v27  ;;  %v607_v59 = vmul.f32 %v572_v40, %v511_v49 }
 0x13d   : > { %v537_v32 = vsub.f32 1.5, %v536_v26  ;;  %v696_v26 = vunpack.c.l.b16 %v629_v9 }
 0x13e   : > { %v1316_v36 = vadd.f32 1e-06, %v502_v21  ;;  %v977_v38 = vpop.eup %976  ;;  %v1325_v43 = vadd.f32 1e-06, %v501_v34  ;;  %v616_v15 = vmul.f32 %v1307_v24, %v607_v59 }
 0x13f   : > { %v538_v42 = vmul.f32 %v975_v6, %v537_v32  ;;  %v574_v47 = vmul.f32 %v977_v38, %v1295_v11  ;;  %v474_v48 = vpop.xlane.xlu1 %473  ;;  %vm580_vm12 = vweird.f32 %v977_v38  ;;  %v512_v11 = vsub.f32 %v1209_v53, %v1277_v54 }
 0x140   : > { %978 = vrsqrt.f32 %v1316_v36  ;;  %v490_v62 = vmul.f32 0.03125, %v474_v48  ;;  %vm581_vm14 = vmor %vm579_vm13, %vm580_vm12  ;;  %v625_v31 = vadd.f32 %v1319_v37, %v616_v15  ;;  %vm559_vm1 = vweird.f32 %v1316_v36 }
 0x141   : > { %v542_v50 = vsel %vm541_vm11, %v975_v6, %v538_v42  ;;  %980 = vrsqrt.f32 %v1325_v43  ;;  %v471_v44 = vpop.xlane.xlu0 %470  ;;  %v442_v35 = vpop.xlane.xlu2 %441  ;;  %v575_v52 = vmul.f32 %v977_v38, %v574_v47  ;;  %vm549_vm3 = vweird.f32 %v1325_v43 }
 0x142   : > { %v489_v55 = vmul.f32 0.03125, %v471_v44  ;;  %v1340_v56 = vmul.f32 0.03125, %v442_v35  ;;  %v604_v57 = vmul.f32 %v542_v50, %v508_v46  ;;  %v633_v40 = vpack.c.bf16 %v625_v31, %v625_v31 }
 0x143   : > { %v576_v60 = vmul.f32 0.5, %v575_v52  ;;  %v509_v48 = vsub.f32 %v1217_v61, %v1293_v10 }
 0x144   : > { %v505_v63 = vsub.f32 %v489_v55, %v497_v51  ;;  %v498_v41 = vmul.f32 %v1340_v56, %v1340_v56  ;;  %v613_v30 = vmul.f32 %v1307_v24, %v604_v57  ;;  %v649_v58 = vunpack.c.l.b16 %v633_v40 }
 0x145   : > { %v577_v2 = vsub.f32 1.5, %v576_v60 }
 0x146   : > { %v979_v0 = vpop.eup %978  ;;  %v1346_v3 = vadd.f32 1e-06, %v505_v63  ;;  %v506_v4 = vsub.f32 %v490_v62, %v498_v41  ;;  %v622_v8 = vadd.f32 %v1319_v37, %v613_v30  ;;  %v513_v30 = vsub.f32 %v1223_v1, %v1313_v33 }
 0x147   : > { %v981_v6 = vpop.eup %980  ;;  %v554_v7 = vmul.f32 %v979_v0, %v1316_v36  ;;  %v578_v13 = vmul.f32 %v977_v38, %v577_v2  ;;  %vm560_vm15 = vweird.f32 %v979_v0  ;;  %v510_v36 = vsub.f32 %v1231_v5, %v1299_v16 }
 0x148   : > { %v544_v14 = vmul.f32 %v981_v6, %v1325_v43  ;;  %982 = vrsqrt.f32 %v1346_v3  ;;  %v1354_v18 = vadd.f32 1e-06, %v506_v4  ;;  %v630_v19 = vpack.c.bf16 %v622_v8, %v622_v8  ;;  %vm1364_vm2 = vmor %vm559_vm1, %vm560_vm15 }
 0x149   : > { %v555_v17 = vmul.f32 %v979_v0, %v554_v7  ;;  %v582_v20 = vsel %vm581_vm14, %v977_v38, %v578_v13  ;;  %vm550_vm0 = vweird.f32 %v981_v6  ;;  %vm589_vm6 = vweird.f32 %v1346_v3 }
 0x14a   : > { %v545_v22 = vmul.f32 %v981_v6, %v544_v14  ;;  %984 = vrsqrt.f32 %v1354_v18  ;;  %v697_v27 = vunpack.c.l.b16 %v630_v19  ;;  %v608_v29 = vmul.f32 %v582_v20, %v512_v11  ;;  %vm551_vm4 = vmor %vm549_vm3, %vm550_vm0 }
 0x14b   : > { %v556_v23 = vmul.f32 0.5, %v555_v17  ;;  %vm599_vm9 = vweird.f32 %v1354_v18 }
 0x14c   : > { %v546_v28 = vmul.f32 0.5, %v545_v22  ;;  %v700_v32 = vpack.c.b16 %v697_v27, %v696_v26  ;;  %v617_v42 = vmul.f32 %v1307_v24, %v608_v29  ;;  %v739_v26 = vperm.slane %v1173_v25, 4 }
 0x14d   : > { %v557_v21 = vsub.f32 1.5, %v556_v23 }
 0x14e   : > { %v983_v34 = vpop.eup %982  ;;  %v547_v39 = vsub.f32 1.5, %v546_v28  ;;  %901 = vmatmul.msk.bf16.vlgmr.msra.gmra.mxu2 %vm418_vm10, %v700_v32  ;;  %v626_v46 = vadd.f32 %v1319_v37, %v617_v42 }
 0x14f   : > { %v558_v53 = vmul.f32 %v979_v0, %v557_v21  ;;  %v584_v54 = vmul.f32 %v983_v34, %v1346_v3  ;;  %vm590_vm5 = vweird.f32 %v983_v34  ;;  %v514_v3 = vsub.f32 %v1241_v12, %v1340_v56 }
 0x150   : > { %v548_v45 = vmul.f32 %v981_v6, %v547_v39  ;;  %v985_v47 = vpop.eup %984  ;;  %v634_v43 = vpack.c.bf16 %v626_v46, %v626_v46  ;;  %vm591_vm7 = vmor %vm589_vm6, %vm590_vm5 }
 0x151   : > { %v562_v49 = vsel %vm1364_vm2, %v979_v0, %v558_v53  ;;  %v585_v50 = vmul.f32 %v983_v34, %v584_v54  ;;  %v594_v44 = vmul.f32 %v985_v47, %v1354_v18  ;;  %vm600_vm8 = vweird.f32 %v985_v47 }
 0x152   : > { %v552_v51 = vsel %vm551_vm4, %v981_v6, %v548_v45  ;;  %v606_v55 = vmul.f32 %v562_v49, %v510_v36  ;;  %v650_v59 = vunpack.c.l.b16 %v634_v43  ;;  %vm601_vm11 = vmor %vm599_vm9, %vm600_vm8 }
 0x153   : > { %v586_v35 = vmul.f32 0.5, %v585_v50  ;;  %v605_v52 = vmul.f32 %v552_v51, %v509_v48  ;;  %v595_v57 = vmul.f32 %v985_v47, %v594_v44 }
 0x154   : > { %v615_v10 = vmul.f32 %v1307_v24, %v606_v55  ;;  %v653_v60 = vpack.c.b16 %v650_v59, %v649_v58 }
 0x155   : > { %v587_v61 = vsub.f32 1.5, %v586_v35  ;;  %v614_v5 = vmul.f32 %v1307_v24, %v605_v52  ;;  %v596_v16 = vmul.f32 0.5, %v595_v57 }
 0x156   : > { %v624_v41 = vadd.f32 %v1319_v37, %v615_v10  ;;  %891 = vmatmul.msk.bf16.vlgmr.msra.gmra.mxu1 %vm418_vm10, %v653_v60 }
 0x157   : > { %v588_v62 = vmul.f32 %v983_v34, %v587_v61  ;;  %v623_v63 = vadd.f32 %v1319_v37, %v614_v5  ;;  %v597_v0 = vsub.f32 1.5, %v596_v16 }
 0x158   : > { %v632_v6 = vpack.c.bf16 %v624_v41, %v624_v41 }
 0x159   : > { %v592_v2 = vsel %vm591_vm7, %v983_v34, %v588_v62  ;;  %v631_v4 = vpack.c.bf16 %v623_v63, %v623_v63  ;;  %v598_v7 = vmul.f32 %v985_v47, %v597_v0 }
 0x15a   : > { %v609_v8 = vmul.f32 %v592_v2, %v513_v30  ;;  %v699_v13 = vunpack.c.l.b16 %v632_v6 }
 0x15b   : > { %v698_v9 = vunpack.c.l.b16 %v631_v4  ;;  %v602_v1 = vsel %vm601_vm11, %v985_v47, %v598_v7 }
 0x15c   : > { %v618_v33 = vmul.f32 %v1307_v24, %v609_v8  ;;  %v610_v14 = vmul.f32 %v602_v1, %v514_v3 }
 0x15d   : > { %v701_v15 = vpack.c.b16 %v699_v13, %v698_v9 }
 0x15e   : > { %v627_v17 = vadd.f32 %v1319_v37, %v618_v33  ;;  %v619_v19 = vmul.f32 %v1307_v24, %v610_v14 }
 0x15f   : > { %902 = vmatmul.msk.bf16.gmra.mxu2 %vm418_vm10, %v701_v15 }
 0x160   : > { %v628_v18 = vadd.f32 %v1319_v37, %v619_v19  ;;  %v635_v11 = vpack.c.bf16 %v627_v17, %v627_v17 }
 0x162   : > { %v636_v12 = vpack.c.bf16 %v628_v18, %v628_v18  ;;  %v651_v56 = vunpack.c.l.b16 %v635_v11 }
 0x164   : > { %v652_v20 = vunpack.c.l.b16 %v636_v12 }
 0x166   : > { %v654_v22 = vpack.c.b16 %v652_v20, %v651_v56 }
 0x168   : > { %892 = vmatmul.msk.bf16.gmra.mxu1 %vm418_vm10, %v654_v22 }
 0x1d1   : > { %v729_v23 = vpop.f32.mrf.mxu2 }
 0x1d3   : > { %v682_v27 = vpop.f32.mrf.mxu1 }
 0x1d4   : > { %v730_v24 = vadd.f32 %v729_v23, %v682_v27 }
 0x1d6   : > { %v740_v28 = vadd.f32 %v739_v26, %v730_v24 }
 0x1d8   : > { %744 = vst [vmem:[%s234_s23] sm:$0xff] %v740_v28 }
 0x1d9   : > { %v731_v37 = vpop.f32.mrf.mxu2 }
 0x1db   : > { %v684_v29 = vpop.f32.mrf.mxu1 }
 0x1dc   : > { %v732_v31 = vadd.f32 %v731_v37, %v684_v29 }
 0x1de   : > { %v741_v21 = vadd.f32 %v739_v26, %v732_v31 }
 0x1e0   : > { %745 = vst [vmem:[%s234_s23 + $0x8] sm:$0xff] %v741_v21 }
 0x1e2   : > { %v734_v32 = vpop.f32.mrf.mxu2 }
 0x1e5   : > { %v687_v34 = vpop.f32.mrf.mxu1 }
 0x1e6   : > { %v735_v39 = vadd.f32 %v734_v32, %v687_v34 }
 0x1e8   : > { %v742_v42 = vadd.f32 %v739_v26, %v735_v39 }
 0x1ea   : > { %746 = vst [vmem:[%s234_s23 + $0x10] sm:$0xff] %v742_v42  ;;  %v736_v25 = vpop.f32.mrf.mxu2 }
 0x1ed   : > { %v689_v53 = vpop.f32.mrf.mxu1 }
 0x1ee   : > { %v737_v54 = vadd.f32 %v736_v25, %v689_v53 }
 0x1f0   : > { %v743_v38 = vadd.f32 %v739_v26, %v737_v54 }
 0x1f2   : > { %747 = vst [vmem:[%s234_s23 + $0x18] sm:$0xff] %v743_v38 }
 0x1f3   : > { %1013 = shalt.err (!%p1010_p3)
}
 0x1f4   : > { %s1051_s16 = smov 128   ;;  %s1052_s17 = smov 8  }
 0x1f5   : > { %925 = dma.vmem_to_hbm [thread:$0]  (%p1121_p5), %s762_s7, 512, %s764_s8, %s749_s9, %s1051_s16, %s1051_s16, %s1052_s17  }
 0x1f6 PF: > { %p931_p4 = scmp.ge.s32.totalorder %s1048_s21, 2  ;;  %s778_s23 = sand.u32 1, %s1036_s18  }
 0x1f7   : > { %s779_s25 = scalar_lea.sflag [#allocation3], %s778_s23 }
 0x1f8   : > { %p928_p7 = pnand %p931_p4, %p1125_p6 }
 0x1fa   : > { %p929_p8 = pneg %p928_p7 }
 0x1fc   : > { %1031 = dma.done.wait (%p929_p8), %s779_s25, 512  }
 0x1fd   : > { %1033 = vsyncadd (%p929_p8), %s779_s25, 4294966784  ;;  %p15_p9 = scmp.ge.s32.totalorder %s1108_s24, 4   ;;  %s1446_s18 = smov %s1040_s19 }
 0x1fe   : > { %s1447_s19 = smov %s1044_s20  ;;  %s1448_s20 = smov %s1119_s27 }
 0x1ff   : > { %s1449_s21 = smov %s1108_s24  ;;  %17 = sbr.rel (!%p15_p9) target bundleno = 3 (0x3), region = 78 }
 0x204   :  { %785 = vsyncpa [#allocation3], 1 }
 0x205   :  { %787 = vsyncpa [#allocation3 + $0x1], 1 }

</bundles_post_ra>
